<compile_context>
chip_gen: v5e
topology: v5e:2x2
jax: 0.10.0
libtpu: 0.0.40
codegen_flags: <defaults>
</compile_context>

<pallas_src>
import math
import functools

import jax
import jax.numpy as jnp
from jax.experimental import pallas as pl
from jax.experimental.pallas import tpu as pltpu


def _aam_kernel(out_ref, tgt_ref, res_ref, *, cos_m, sin_m, th, mm,
                scale, easy_margin):
    # Elementwise hot path, all in f32 (VPU / memory bound).
    cosine = out_ref[...].astype(jnp.float32)
    targets = tgt_ref[...].astype(jnp.float32)

    # sine = sqrt(1 - cosine^2); clamp to avoid NaN from tiny negative values
    # (also keeps any zero-padded tail finite).
    sine = jnp.sqrt(jnp.maximum(1.0 - cosine * cosine, 0.0))
    phi = cosine * cos_m - sine * sin_m

    if easy_margin:
        phi = jnp.where(cosine > 0.0, phi, cosine)
    else:
        phi = jnp.where(cosine > th, phi, cosine - mm)

    # t*phi + (1-t)*cosine == cosine + t*(phi - cosine)
    out = cosine + targets * (phi - cosine)
    res_ref[...] = (scale * out).astype(res_ref.dtype)


def _round_up(x, m):
    return (x + m - 1) // m * m


def additive_angular_margin(outputs, targets, *, margin=0.0, scale=1.0,
                            easy_margin=False):
    """Pallas equivalent of AdditiveAngularMargin.forward."""
    assert outputs.shape == targets.shape
    B, C = outputs.shape

    cos_m = math.cos(margin)
    sin_m = math.sin(margin)
    th = math.cos(math.pi - margin)
    mm = math.sin(math.pi - margin) * margin

    kernel = functools.partial(
        _aam_kernel,
        cos_m=cos_m, sin_m=sin_m, th=th, mm=mm,
        scale=scale, easy_margin=easy_margin,
    )

    # ---- tile-size selection (VMEM-budgeted, lane-dense) -------------------
    # Sublane granularity: 8 for 32-bit inputs, 16 if any input is 16-bit.
    itemsize = min(jnp.dtype(outputs.dtype).itemsize,
                   jnp.dtype(targets.dtype).itemsize)
    sub = 8 if itemsize >= 4 else 16

    # Class-axis tile: multiple of 128 lanes. Use the full (padded) class axis
    # when it is small; otherwise 1024 lanes keeps padding negligible.
    c_pad128 = _round_up(C, 128)
    bc = c_pad128 if c_pad128 <= 2048 else 1024
    Cp = _round_up(C, bc)

    # Batch-axis tile: target ~2 MiB f32 tiles. 3 arrays x 2 buffers -> ~12 MiB
    # VMEM, within the scoped limit on every TPU generation (incl. v7x 64 MiB).
    target_tile_bytes = 2 * 1024 * 1024
    br = max(sub, (target_tile_bytes // (4 * bc)) // sub * sub)
    br = min(br, _round_up(B, sub))
    Bp = _round_up(B, br)

    # Zero-pad so every tile is full and stores are unmasked / lane-dense.
    if (Bp, Cp) != (B, C):
        pad = ((0, Bp - B), (0, Cp - C))
        outputs_p = jnp.pad(outputs, pad)
        targets_p = jnp.pad(targets, pad)
    else:
        outputs_p, targets_p = outputs, targets

    grid = (Bp // br, Cp // bc)
    spec = pl.BlockSpec((br, bc), lambda i, j: (i, j))

    result = pl.pallas_call(
        kernel,
        out_shape=jax.ShapeDtypeStruct((Bp, Cp), jnp.float32),
        grid_spec=pltpu.PrefetchScalarGridSpec(
            num_scalar_prefetch=0,
            grid=grid,
            in_specs=[spec, spec],
            out_specs=spec,
        ),
        compiler_params=pltpu.CompilerParams(
            dimension_semantics=("parallel", "parallel"),
            vmem_limit_bytes=32 * 1024 * 1024,
        ),
    )(outputs_p, targets_p)

    if (Bp, Cp) != (B, C):
        result = result[:B, :C]
    return result


def _reference(outputs, targets, *, margin, scale, easy_margin):
    # Pure-JAX reference mirroring the PyTorch forward.
    cos_m = math.cos(margin)
    sin_m = math.sin(margin)
    th = math.cos(math.pi - margin)
    mm = math.sin(math.pi - margin) * margin
    cosine = outputs.astype(jnp.float32)
    sine = jnp.sqrt(jnp.maximum(1.0 - cosine ** 2, 0.0))
    phi = cosine * cos_m - sine * sin_m
    if easy_margin:
        phi = jnp.where(cosine > 0, phi, cosine)
    else:
        phi = jnp.where(cosine > th, phi, cosine - mm)
    out = targets * phi + (1.0 - targets) * cosine
    return scale * out


if __name__ == "__main__":
    key = jax.random.PRNGKey(0)
    k1, k2 = jax.random.split(key)

    # Small shapes: batch=8 speaker embeddings scored against 256 classes.
    B, C = 8, 256
    margin, scale, easy_margin = 0.2, 30.0, False

    # "outputs" are cosine similarities in [-1, 1].
    outputs = jnp.tanh(jax.random.normal(k1, (B, C), dtype=jnp.float32))
    # "targets" are one-hot labels (module also supports soft targets).
    labels = jax.random.randint(k2, (B,), 0, C)
    targets = jax.nn.one_hot(labels, C, dtype=jnp.float32)

    result = additive_angular_margin(
        outputs, targets, margin=margin, scale=scale, easy_margin=easy_margin)
    result = jax.block_until_ready(result)

    expected = _reference(outputs, targets, margin=margin, scale=scale,
                          easy_margin=easy_margin)
    assert result.shape == (B, C) and result.dtype == jnp.float32
    assert jnp.allclose(result, expected, atol=1e-5, rtol=1e-5)

    # Quick check of a non-aligned / padded shape and the easy_margin branch.
    B2, C2 = 5, 200
    o2 = jnp.tanh(jax.random.normal(k1, (B2, C2), dtype=jnp.float32))
    t2 = jax.nn.one_hot(jax.random.randint(k2, (B2,), 0, C2), C2,
                        dtype=jnp.float32)
    r2 = jax.block_until_ready(additive_angular_margin(
        o2, t2, margin=0.3, scale=15.0, easy_margin=True))
    e2 = _reference(o2, t2, margin=0.3, scale=15.0, easy_margin=True)
    assert r2.shape == (B2, C2)
    assert jnp.allclose(r2, e2, atol=1e-5, rtol=1e-5)

    print("KERNEL_OK")
</pallas_src>

<mosaic_0001>
module attributes {stable_mosaic.version = 11 : i64} {
  func.func @_aam_kernel(%arg0: i32, %arg1: i32, %arg2: memref<8x256xf32, #tpu.memory_space<vmem>>, %arg3: memref<8x256xf32, #tpu.memory_space<vmem>>, %arg4: memref<8x256xf32, #tpu.memory_space<vmem>>) attributes {dimension_semantics = [#tpu.dimension_semantics<parallel>, #tpu.dimension_semantics<parallel>], iteration_bounds = array<i64: 1, 1>, scalar_prefetch = 0 : i64, scratch_operands = 0 : i64, tpu.core_type = #tpu.core_type<tc>, window_params = [{transform_indices = @transform_0, window_bounds = array<i64: 8, 256>}, {transform_indices = @transform_1, window_bounds = array<i64: 8, 256>}, {transform_indices = @transform_2, window_bounds = array<i64: 8, 256>}]} {
    %c0 = arith.constant 0 : index
    %c0_0 = arith.constant 0 : index
    %0 = vector.load %arg2[%c0, %c0_0] : memref<8x256xf32, #tpu.memory_space<vmem>>, vector<8x256xf32>
    %c0_1 = arith.constant 0 : index
    %c0_2 = arith.constant 0 : index
    %1 = vector.load %arg3[%c0_1, %c0_2] : memref<8x256xf32, #tpu.memory_space<vmem>>, vector<8x256xf32>
    %2 = arith.mulf %0, %0 : vector<8x256xf32>
    %cst = arith.constant 1.000000e+00 : f32
    %3 = vector.broadcast %cst : f32 to vector<8x256xf32>
    %4 = arith.subf %3, %2 : vector<8x256xf32>
    %cst_3 = arith.constant 0.000000e+00 : f32
    %5 = vector.broadcast %cst_3 : f32 to vector<8x256xf32>
    %6 = arith.maximumf %4, %5 : vector<8x256xf32>
    %7 = math.sqrt %6 : vector<8x256xf32>
    %cst_4 = arith.constant 0.980066597 : f32
    %8 = vector.broadcast %cst_4 : f32 to vector<8x256xf32>
    %9 = arith.mulf %0, %8 : vector<8x256xf32>
    %cst_5 = arith.constant 0.198669329 : f32
    %10 = vector.broadcast %cst_5 : f32 to vector<8x256xf32>
    %11 = arith.mulf %7, %10 : vector<8x256xf32>
    %12 = arith.subf %9, %11 : vector<8x256xf32>
    %cst_6 = arith.constant -0.980066597 : f32
    %13 = vector.broadcast %cst_6 : f32 to vector<8x256xf32>
    %14 = arith.cmpf ogt, %0, %13 : vector<8x256xf32>
    %cst_7 = arith.constant 0.0397338644 : f32
    %15 = vector.broadcast %cst_7 : f32 to vector<8x256xf32>
    %16 = arith.subf %0, %15 : vector<8x256xf32>
    %17 = arith.select %14, %12, %16 : vector<8x256xi1>, vector<8x256xf32>
    %18 = arith.subf %17, %0 : vector<8x256xf32>
    %19 = arith.mulf %1, %18 : vector<8x256xf32>
    %20 = arith.addf %0, %19 : vector<8x256xf32>
    %cst_8 = arith.constant 3.000000e+01 : f32
    %21 = vector.broadcast %cst_8 : f32 to vector<8x256xf32>
    %22 = arith.mulf %21, %20 : vector<8x256xf32>
    %c0_9 = arith.constant 0 : index
    %c0_10 = arith.constant 0 : index
    %23 = vector.load %arg4[%c0_9, %c0_10] : memref<8x256xf32, #tpu.memory_space<vmem>>, vector<8x256xf32>
    tpu.vector_store %arg4[%c0_9, %c0_10], %22 {strides = array<i32>} : memref<8x256xf32, #tpu.memory_space<vmem>>, vector<8x256xf32>,
    return
  }
  func.func @transform_0(%arg0: i32, %arg1: i32) -> (i32, i32) {
    %c0_i32 = arith.constant 0 : i32
    return %arg0, %arg1 : i32, i32
  }
  func.func @transform_1(%arg0: i32, %arg1: i32) -> (i32, i32) {
    %c0_i32 = arith.constant 0 : i32
    return %arg0, %arg1 : i32, i32
  }
  func.func @transform_2(%arg0: i32, %arg1: i32) -> (i32, i32) {
    %c0_i32 = arith.constant 0 : i32
    return %arg0, %arg1 : i32, i32
  }
}

</mosaic_0001>

<bundles_post_ra>
// kernel: tpu_custom_call.1
= control target key start
LH: loop header
LB: loop body
LE: loop exit
PB: predicated region body
PF: predicated region fallthrough
CT: control target
= control target key end

     0   :  { %7 = vsyncpa [#allocation3], 0  ;;  %s228_s0 = inlined_call_operand.hbm [shape: f32[8,256], index: 0, kind: input, shape index: {}]   ;;  %s229_s1 = inlined_call_operand.hbm [shape: f32[8,256], index: 1, kind: input, shape index: {}]   ;;  %s230_s2 = inlined_call_operand.hbm [shape: f32[8,256], index: 2, kind: output, shape index: {}]  }
   0x1   :  { %8 = vsyncpa [#allocation6], 0 }
   0x2   :  { %9 = vsyncpa [#allocation4], 0  ;;  %s15_s11 = sshll.u32 %s228_s0, 4  ;;  %s201_s12 = smov [#allocation2]   ;;  %s16_s11 = int_to_ptr.hbm [resolvable:$true] %s15_s11 }
   0x3   :  { %s17_s13 = sshll.u32 %s201_s12, 4  ;;  %s26_s16 = sshll.u32 %s229_s1, 4  ;;  %s18_s13 = int_to_ptr.vmem [resolvable:$true] %s17_s13  ;;  %s27_s16 = int_to_ptr.hbm [resolvable:$true] %s26_s16 }
   0x4   :  { %20 = dma.hbm_to_vmem [thread:$0]  %s16_s11, 256, %s18_s13, [#allocation3]  }
   0x5   :  { %s202_s17 = smov [#allocation5]  }
   0x6   :  { %s28_s18 = sshll.u32 %s202_s17, 4  ;;  %s29_s18 = int_to_ptr.vmem [resolvable:$true] %s28_s18 }
   0x7   :  { %31 = dma.hbm_to_vmem [thread:$0]  %s27_s16, 256, %s29_s18, [#allocation6]  }
   0x8   :  { %195 = dma.done.wait [#allocation3], 256  }
   0x9   :  { %196 = vsyncadd [#allocation3], 4294967040 }
   0xa   :  { %197 = dma.done.wait [#allocation6], 256  }
   0xb   :  { %198 = vsyncadd [#allocation6], 4294967040  ;;  %v40_v0 = vld [vmem:[#allocation2] sm:$0xff]  ;;  %v41_v1 = vld [vmem:[#allocation2 + $0x8] sm:$0xff]  ;;  %s203_s0 = smov [#allocation7]   ;;  %s103_s21 = sshll.u32 %s230_s2, 4  ;;  %s104_s21 = int_to_ptr.hbm [resolvable:$true] %s103_s21 }
   0xc   :  { %v44_v2 = vmul.f32 %v40_v0, %v40_v0  ;;  %v45_v3 = vmul.f32 %v41_v1, %v41_v1  ;;  %v74_v25 = vmul.f32 0.9800666, %v40_v0  ;;  %v75_v28 = vmul.f32 0.9800666, %v41_v1  ;;  %v42_v36 = vld [vmem:[#allocation5] sm:$0xff]  ;;  %v43_v39 = vld [vmem:[#allocation5 + $0x8] sm:$0xff] }
   0xd   :  { %v114_v30 = vadd.f32 -0.039733864, %v40_v0  ;;  %vm80_vm4 = vcmp.gt.f32.partialorder %v40_v0, -0.9800666  ;;  %v115_v33 = vadd.f32 -0.039733864, %v41_v1 }
   0xe   :  { %v46_v4 = vsub.f32 1.0, %v44_v2  ;;  %v47_v5 = vsub.f32 1.0, %v45_v3  ;;  %vm81_vm5 = vcmp.gt.f32.partialorder %v41_v1, -0.9800666  ;;  %s101_s1 = sshll.u32 %s203_s0, 4  ;;  %s102_s1 = int_to_ptr.vmem [resolvable:$true] %s101_s1 }
  0x10   :  { %v48_v6 = vmax.f32 %v46_v4, 0.0  ;;  %v49_v7 = vmax.f32 %v47_v5, 0.0 }
  0x12   :  { %119 = vrsqrt.f32 %v48_v6  ;;  %vm57_vm0 = vcmp.eq.f32.partialorder %v48_v6, inf  ;;  %v60_v19 = vand.u32 2147483648, %v48_v6  ;;  %vm59_vm1 = vcmp.eq.f32.partialorder %v48_v6, 0.0 }
  0x13   :  { %121 = vrsqrt.f32 %v49_v7  ;;  %vm69_vm2 = vcmp.eq.f32.partialorder %v49_v7, inf  ;;  %v72_v22 = vand.u32 2147483648, %v49_v7  ;;  %vm71_vm3 = vcmp.eq.f32.partialorder %v49_v7, 0.0 }
  0x18   :  { %v120_v8 = vpop.eup %119 }
  0x19   :  { %v122_v9 = vpop.eup %121  ;;  %v51_v10 = vmul.f32 %v120_v8, %v48_v6 }
  0x1a   :  { %v63_v11 = vmul.f32 %v122_v9, %v49_v7 }
  0x1b   :  { %v52_v12 = vmul.f32 %v120_v8, %v51_v10 }
  0x1c   :  { %v64_v13 = vmul.f32 %v122_v9, %v63_v11 }
  0x1d   :  { %v53_v14 = vmul.f32 0.5, %v52_v12 }
  0x1e   :  { %v65_v15 = vmul.f32 0.5, %v64_v13 }
  0x1f   :  { %v54_v16 = vsub.f32 1.5, %v53_v14 }
  0x20   :  { %v66_v17 = vsub.f32 1.5, %v65_v15 }
  0x21   :  { %v55_v18 = vmul.f32 %v120_v8, %v54_v16 }
  0x22   :  { %v67_v20 = vmul.f32 %v122_v9, %v66_v17 }
  0x23   :  { %v56_v21 = vmul.f32 %v55_v18, %v48_v6 }
  0x24   :  { %v68_v23 = vmul.f32 %v67_v20, %v49_v7 }
  0x25   :  { %v58_v24 = vsel %vm57_vm0, %v48_v6, %v56_v21 }
  0x26   :  { %v61_v26 = vsel %vm59_vm1, %v60_v19, %v58_v24  ;;  %v70_v27 = vsel %vm69_vm2, %v49_v7, %v68_v23 }
  0x27   :  { %v76_v29 = vmul.f32 0.19866933, %v61_v26  ;;  %v73_v31 = vsel %vm71_vm3, %v72_v22, %v70_v27 }
  0x28   :  { %v77_v32 = vmul.f32 0.19866933, %v73_v31 }
  0x29   :  { %v78_v34 = vsub.f32 %v74_v25, %v76_v29 }
  0x2a   :  { %v79_v35 = vsub.f32 %v75_v28, %v77_v32 }
  0x2b   :  { %v84_v37 = vsel %vm80_vm4, %v78_v34, %v114_v30 }
  0x2c   :  { %v86_v38 = vsub.f32 %v84_v37, %v40_v0  ;;  %v85_v40 = vsel %vm81_vm5, %v79_v35, %v115_v33 }
  0x2d   :  { %v87_v41 = vsub.f32 %v85_v40, %v41_v1 }
  0x2e   :  { %v88_v42 = vmul.f32 %v86_v38, %v42_v36 }
  0x2f   :  { %v89_v43 = vmul.f32 %v87_v41, %v43_v39 }
  0x30   :  { %v90_v44 = vadd.f32 %v88_v42, %v40_v0 }
  0x31   :  { %v91_v45 = vadd.f32 %v89_v43, %v41_v1 }
  0x32   :  { %v92_v46 = vmul.f32 30.0, %v90_v44 }
  0x33   :  { %v93_v47 = vmul.f32 30.0, %v91_v45 }
  0x34   :  { %94 = vst [vmem:[#allocation7] sm:$0xff] %v92_v46 }
  0x35   :  { %95 = vst [vmem:[#allocation7 + $0x8] sm:$0xff] %v93_v47 }
  0x36   :  { %106 = dma.vmem_to_hbm [thread:$0]  %s102_s1, 256, %s104_s21, [#allocation4]  }
  0x37   :  { %199 = dma.done.wait [#allocation4], 256  }
  0x38   :  { %200 = vsyncadd [#allocation4], 4294967040 }
  0x39   :  { %111 = vsyncpa [#allocation3], 1 }
  0x3a   :  { %112 = vsyncpa [#allocation6], 1 }
  0x3b   :  { %113 = vsyncpa [#allocation4], 1 }

</bundles_post_ra>
